<compile_context>
chip_gen: v7x
topology: tpu7x:2x2x1
jax: 0.10.0
libtpu: 0.0.40
codegen_flags: <defaults>
</compile_context>

<pallas_src>
import functools

import jax
import jax.numpy as jnp
from jax.experimental import pallas as pl
from jax.experimental.pallas import tpu as pltpu


def _round_up(x, m):
    return (x + m - 1) // m * m


def _st_gcn_kernel(x_ref, w_ref, bd_ref, bz_ref, o_ref, *, K, n_groups, G, unroll):
    """Per-(batch, T-chunk) tile.

    x_ref : (C_pad, L)        L = n_groups * G lanes,  G = gg * V (one 128-lane group)
    w_ref : (C_pad, K*C_pad)  w[c, k*C_pad + i] = conv weight W[k, c, i]
    bd_ref: (K, G, G)         BD_k = I_gg (x) A_k   (per-group block-diag adjacency)
    bz_ref: (C_pad, G)        conv bias folded through the adjacency (fp32)
    o_ref : (C_pad, L)        relu(gcn + identity residual)
    """
    wcat = w_ref[...]                                   # (C_pad, K*C_pad)
    bz = bz_ref[...].astype(jnp.float32)                # (C_pad, G)

    def group(lo):
        xq = x_ref[:, pl.ds(lo, G)]                     # (C_pad, G)
        # Per-frame graph aggregation for each of the K partitions, stacked along
        # the contraction dim so the k-sum is folded into the single matmul below.
        xa = jnp.concatenate(
            [jnp.dot(xq, bd_ref[k], preferred_element_type=jnp.float32).astype(xq.dtype)
             for k in range(K)],
            axis=0)                                     # (K*C_pad, G)
        # Fused 1x1 conv (+ folded bias seed), fp32 accumulation on the MXU.
        z = bz + jnp.dot(wcat, xa, preferred_element_type=jnp.float32)
        # Identity residual + ReLU in fp32, full-sublane lane-aligned store.
        o_ref[:, pl.ds(lo, G)] = jnp.maximum(
            z + xq.astype(jnp.float32), 0.0).astype(o_ref.dtype)

    if unroll:
        for q in range(n_groups):
            group(q * G)
    else:
        def body(q, carry):
            lo = q * G
            if G % 128 == 0:
                lo = pl.multiple_of(lo, 128)
            group(lo)
            return carry
        jax.lax.fori_loop(0, n_groups, body, 0)


def _frames_per_group(V):
    """Frames per 128-lane-aligned group (keeps in-kernel slices/stores unmasked)."""
    if V < 128 and 128 % V == 0:
        return 128 // V
    return 1


def _largest_group(g, tb):
    return max(d for d in range(1, min(g, tb) + 1) if tb % d == 0)


def _choose_tiling(T, V, C_pad, itemsize, *, tile_budget_bytes=2 << 20,
                   max_groups_per_tile=8, min_t_chunks=2):
    """Pick (t_block, gg): t_block divides T, L = t_block*V is 128-aligned (or full),
    the tile fits a modest VMEM budget, and >= 2 T-chunks are kept when possible."""
    g = _frames_per_group(V)

    def legal(tb):
        L = tb * V
        if L % 128 != 0 and tb != T:
            return False
        if C_pad * L * itemsize > tile_budget_bytes:
            return False
        return (tb // _largest_group(g, tb)) <= max_groups_per_tile

    cands = [d for d in range(1, T + 1) if T % d == 0 and legal(d)]
    if not cands:
        cands = [T]  # pathological (T, V): one full-T tile (see TODO at top)
    multi = [d for d in cands if T // d >= min_t_chunks]
    tb = max(multi) if multi else max(cands)
    return tb, _largest_group(g, tb)


def st_gcn_forward(x, A, conv_weight, conv_bias, *, t_block=None):
    """x: (N, C_in, T, V), A: (K, V, V), conv_weight: (K*C_out, C_in),
    conv_bias: (K*C_out,).  Returns (relu(gcn(x, A) + x), A) — st_gcn.forward with
    residual=True, in_channels == out_channels, stride == 1."""
    N, C_in, T, V = x.shape
    K = A.shape[0]
    C_out = conv_weight.shape[0] // K
    assert C_out * K == conv_weight.shape[0]
    assert C_out == C_in, "identity residual path requires in_channels == out_channels"
    C = C_in
    C_pad = max(8, _round_up(C, 8))
    dtype = x.dtype
    itemsize = jnp.dtype(dtype).itemsize

    if t_block is None:
        t_block, gg = _choose_tiling(T, V, C_pad, itemsize)
    else:
        assert T % t_block == 0
        gg = _largest_group(_frames_per_group(V), t_block)
    G = gg * V
    L = t_block * V
    n_groups = t_block // gg

    # Pad channels to a full sublane (only when needed) -> unmasked stores.
    if C_pad != C:
        x = jnp.pad(x, ((0, 0), (0, C_pad - C), (0, 0), (0, 0)))
    x_r = x.reshape(N, C_pad, T * V)

    # Fused conv weight, laid out for the aggregate-first contraction:
    #   w_cat[c, k*C_pad + i] = W[k, c, i]
    w_r = conv_weight.reshape(K, C, C)
    w_cat = jnp.zeros((C_pad, K, C_pad), dtype=dtype)
    w_cat = w_cat.at[:C, :, :C].set(jnp.transpose(w_r, (1, 0, 2)).astype(dtype))
    w_cat = w_cat.reshape(C_pad, K * C_pad)

    # Per-group block-diagonal adjacency  BD_k = I_gg (x) A_k   -> (K, G, G).
    eye = jnp.eye(gg, dtype=dtype)
    bd = jnp.einsum("ts,kvw->ktvsw", eye, A.astype(dtype)).reshape(K, G, G)

    # Conv bias folded through the adjacency (independent of the frame index):
    #   bz[c, w] = sum_k b[k, c] * sum_v A[k, v, w]
    b_r = conv_bias.reshape(K, C).astype(jnp.float32)
    colsum = A.astype(jnp.float32).sum(axis=1)                  # (K, V)
    bz_v = jnp.einsum("kc,kw->cw", b_r, colsum)                 # (C, V)
    bz = jnp.zeros((C_pad, G), dtype=jnp.float32)
    bz = bz.at[:C, :].set(jnp.tile(bz_v, (1, gg)))

    grid = (N, T // t_block)
    unroll = n_groups <= 8
    kernel = functools.partial(_st_gcn_kernel, K=K, n_groups=n_groups, G=G,
                               unroll=unroll)

    # Explicit per-generation VMEM budget (double-buffered worst case, headroom kept).
    tile_bytes = C_pad * L * itemsize
    const_bytes = (w_cat.size + bd.size) * itemsize + bz.size * 4
    footprint = 2 * (2 * tile_bytes + const_bytes)
    try:
        cap = getattr(pltpu.get_tpu_info(), "vmem_capacity_bytes", 64 << 20)
    except Exception:  # pragma: no cover - defensive: query unavailable
        cap = 64 << 20
    vmem_limit = int(min(max(2 * footprint, 16 << 20), cap // 2))

    out = pl.pallas_call(
        kernel,
        out_shape=jax.ShapeDtypeStruct((N, C_pad, T * V), dtype),
        grid=grid,
        in_specs=[
            pl.BlockSpec((None, C_pad, L), lambda n, tc: (n, 0, tc)),
            pl.BlockSpec((C_pad, K * C_pad), lambda n, tc: (0, 0)),
            pl.BlockSpec((K, G, G), lambda n, tc: (0, 0, 0)),
            pl.BlockSpec((C_pad, G), lambda n, tc: (0, 0)),
        ],
        out_specs=pl.BlockSpec((None, C_pad, L), lambda n, tc: (n, 0, tc)),
        compiler_params=pltpu.CompilerParams(
            dimension_semantics=("parallel", "parallel"),
            vmem_limit_bytes=vmem_limit),
    )(x_r, w_cat, bd, bz)

    if C_pad != C:
        out = out[:, :C, :]
    return out.reshape(N, C, T, V), A


if __name__ == "__main__":
    # in_channels == out_channels == 4, kernel_size K = 3 (odd), stride = 1, residual = True
    N, C, T, V, K = 2, 4, 8, 16, 3

    key = jax.random.PRNGKey(0)
    kx, ka, kw, kb = jax.random.split(key, 4)
    x = jax.random.normal(kx, (N, C, T, V), dtype=jnp.float32)
    A = jax.nn.softmax(jax.random.normal(ka, (K, V, V), dtype=jnp.float32), axis=-1)
    # Conv2d(C, K*C, kernel_size=(1,1)) params, with the trailing (1,1) squeezed away.
    conv_weight = 0.1 * jax.random.normal(kw, (K * C, C), dtype=jnp.float32)
    conv_bias = 0.1 * jax.random.normal(kb, (K * C,), dtype=jnp.float32)

    out, A_out = st_gcn_forward(x, A, conv_weight, conv_bias)
    out = jax.block_until_ready(out)

    # Pure-JAX reference of the PyTorch forward.
    y = jnp.einsum("oc,nctv->notv", conv_weight, x) + conv_bias[None, :, None, None]
    y = y.reshape(N, K, C, T, V)
    z = jnp.einsum("nkctv,kvw->nctw", y, A)
    ref = jax.nn.relu(z + x)

    assert out.shape == (N, C, T, V)
    assert jnp.allclose(out, ref, rtol=1e-4, atol=1e-4), float(jnp.max(jnp.abs(out - ref)))
    assert jnp.array_equal(A_out, A)
    print("KERNEL_OK")
</pallas_src>

<mosaic_0001>
module attributes {stable_mosaic.version = 11 : i64} {
  func.func @_st_gcn_kernel(%arg0: i32, %arg1: i32, %arg2: memref<1x8x128xf32, #tpu.memory_space<vmem>>, %arg3: memref<8x24xf32, #tpu.memory_space<vmem>>, %arg4: memref<3x128x128xf32, #tpu.memory_space<vmem>>, %arg5: memref<8x128xf32, #tpu.memory_space<vmem>>, %arg6: memref<1x8x128xf32, #tpu.memory_space<vmem>>) attributes {dimension_semantics = [#tpu.dimension_semantics<parallel>, #tpu.dimension_semantics<parallel>], iteration_bounds = array<i64: 2, 1>, scalar_prefetch = 0 : i64, scratch_operands = 0 : i64, tpu.core_type = #tpu.core_type<tc>, window_params = [{transform_indices = @transform_0, window_bounds = array<i64: 1, 8, 128>}, {pipeline_mode = #tpu.pipeline_mode<synchronous>, transform_indices = @transform_1, window_bounds = array<i64: 8, 24>}, {pipeline_mode = #tpu.pipeline_mode<synchronous>, transform_indices = @transform_2, window_bounds = array<i64: 3, 128, 128>}, {pipeline_mode = #tpu.pipeline_mode<synchronous>, transform_indices = @transform_3, window_bounds = array<i64: 8, 128>}, {transform_indices = @transform_4, window_bounds = array<i64: 1, 8, 128>}]} {
    %c0 = arith.constant 0 : index
    %c0_0 = arith.constant 0 : index
    %0 = vector.load %arg3[%c0, %c0_0] : memref<8x24xf32, #tpu.memory_space<vmem>>, vector<8x24xf32>
    %c0_1 = arith.constant 0 : index
    %c0_2 = arith.constant 0 : index
    %1 = vector.load %arg5[%c0_1, %c0_2] : memref<8x128xf32, #tpu.memory_space<vmem>>, vector<8x128xf32>
    %c0_3 = arith.constant 0 : index
    %c0_4 = arith.constant 0 : index
    %c0_5 = arith.constant 0 : index
    %2 = vector.load %arg2[%c0_3, %c0_4, %c0_5] : memref<1x8x128xf32, #tpu.memory_space<vmem>>, vector<1x8x128xf32>
    %3 = vector.shape_cast %2 : vector<1x8x128xf32> to vector<8x128xf32>
    %c0_6 = arith.constant 0 : index
    %c0_7 = arith.constant 0 : index
    %c0_8 = arith.constant 0 : index
    %4 = vector.load %arg4[%c0_6, %c0_7, %c0_8] : memref<3x128x128xf32, #tpu.memory_space<vmem>>, vector<1x128x128xf32>
    %5 = vector.shape_cast %4 : vector<1x128x128xf32> to vector<128x128xf32>
    %cst = arith.constant dense<0.000000e+00> : vector<8x128xf32>
    %6 = tpu.matmul %3, %5, %cst {dimension_numbers = #tpu.dot_dimension_numbers<[1], [0], [0], [1], [0, 0, 1, 1], [], []>} : vector<8x128xf32>, vector<128x128xf32>, vector<8x128xf32> -> vector<8x128xf32>
    %c1 = arith.constant 1 : index
    %c0_9 = arith.constant 0 : index
    %c0_10 = arith.constant 0 : index
    %7 = vector.load %arg4[%c1, %c0_9, %c0_10] : memref<3x128x128xf32, #tpu.memory_space<vmem>>, vector<1x128x128xf32>
    %8 = vector.shape_cast %7 : vector<1x128x128xf32> to vector<128x128xf32>
    %cst_11 = arith.constant dense<0.000000e+00> : vector<8x128xf32>
    %9 = tpu.matmul %3, %8, %cst_11 {dimension_numbers = #tpu.dot_dimension_numbers<[1], [0], [0], [1], [0, 0, 1, 1], [], []>} : vector<8x128xf32>, vector<128x128xf32>, vector<8x128xf32> -> vector<8x128xf32>
    %c2 = arith.constant 2 : index
    %c0_12 = arith.constant 0 : index
    %c0_13 = arith.constant 0 : index
    %10 = vector.load %arg4[%c2, %c0_12, %c0_13] : memref<3x128x128xf32, #tpu.memory_space<vmem>>, vector<1x128x128xf32>
    %11 = vector.shape_cast %10 : vector<1x128x128xf32> to vector<128x128xf32>
    %cst_14 = arith.constant dense<0.000000e+00> : vector<8x128xf32>
    %12 = tpu.matmul %3, %11, %cst_14 {dimension_numbers = #tpu.dot_dimension_numbers<[1], [0], [0], [1], [0, 0, 1, 1], [], []>} : vector<8x128xf32>, vector<128x128xf32>, vector<8x128xf32> -> vector<8x128xf32>
    %13 = tpu.concatenate %6, %9, %12 in 0 : vector<8x128xf32>, vector<8x128xf32>, vector<8x128xf32> -> vector<24x128xf32>
    %cst_15 = arith.constant dense<0.000000e+00> : vector<8x128xf32>
    %14 = tpu.matmul %0, %13, %cst_15 {dimension_numbers = #tpu.dot_dimension_numbers<[1], [0], [0], [1], [0, 0, 1, 1], [], []>} : vector<8x24xf32>, vector<24x128xf32>, vector<8x128xf32> -> vector<8x128xf32>
    %15 = arith.addf %1, %14 : vector<8x128xf32>
    %16 = arith.addf %15, %3 : vector<8x128xf32>
    %cst_16 = arith.constant 0.000000e+00 : f32
    %17 = vector.broadcast %cst_16 : f32 to vector<8x128xf32>
    %18 = arith.maximumf %16, %17 : vector<8x128xf32>
    %c0_17 = arith.constant 0 : index
    %c0_18 = arith.constant 0 : index
    %c0_19 = arith.constant 0 : index
    %19 = vector.load %arg6[%c0_17, %c0_18, %c0_19] : memref<1x8x128xf32, #tpu.memory_space<vmem>>, vector<1x8x128xf32>
    %20 = vector.shape_cast %19 : vector<1x8x128xf32> to vector<8x128xf32>
    %21 = vector.shape_cast %18 : vector<8x128xf32> to vector<1x8x128xf32>
    tpu.vector_store %arg6[%c0_17, %c0_18, %c0_19], %21 {strides = array<i32>} : memref<1x8x128xf32, #tpu.memory_space<vmem>>, vector<1x8x128xf32>,
    return
  }
  func.func @transform_0(%arg0: i32, %arg1: i32) -> (i32, i32, i32) {
    %c0_i32 = arith.constant 0 : i32
    %c0_i32_0 = arith.constant 0 : i32
    return %arg0, %c0_i32, %arg1 : i32, i32, i32
  }
  func.func @transform_1(%arg0: i32, %arg1: i32) -> (i32, i32) {
    %c0_i32 = arith.constant 0 : i32
    %c0_i32_0 = arith.constant 0 : i32
    %c0_i32_1 = arith.constant 0 : i32
    return %c0_i32, %c0_i32_0 : i32, i32
  }
  func.func @transform_2(%arg0: i32, %arg1: i32) -> (i32, i32, i32) {
    %c0_i32 = arith.constant 0 : i32
    %c0_i32_0 = arith.constant 0 : i32
    %c0_i32_1 = arith.constant 0 : i32
    %c0_i32_2 = arith.constant 0 : i32
    return %c0_i32, %c0_i32_0, %c0_i32_1 : i32, i32, i32
  }
  func.func @transform_3(%arg0: i32, %arg1: i32) -> (i32, i32) {
    %c0_i32 = arith.constant 0 : i32
    %c0_i32_0 = arith.constant 0 : i32
    %c0_i32_1 = arith.constant 0 : i32
    return %c0_i32, %c0_i32_0 : i32, i32
  }
  func.func @transform_4(%arg0: i32, %arg1: i32) -> (i32, i32, i32) {
    %c0_i32 = arith.constant 0 : i32
    %c0_i32_0 = arith.constant 0 : i32
    return %arg0, %c0_i32, %arg1 : i32, i32, i32
  }
}

</mosaic_0001>

<bundles_post_ra>
// kernel: tpu_custom_call.1
= control target key start
LH: loop header
LB: loop body
LE: loop exit
PB: predicated region body
PF: predicated region fallthrough
CT: control target
= control target key end

     0   :  { %9 = vsyncpa [#allocation3], 0  ;;  %s1563_s0 = inlined_call_operand.hbm [shape: f32[2,8,128], index: 0, kind: input, shape index: {}]   ;;  %s1564_s1 = inlined_call_operand.hbm [shape: f32[8,24], index: 1, kind: input, shape index: {}]   ;;  %s1565_s2 = inlined_call_operand.hbm [shape: f32[3,128,128], index: 2, kind: input, shape index: {}]   ;;  %s1566_s3 = inlined_call_operand.vmem [shape: f32[8,128], index: 3, kind: input, shape index: {}]   ;;  %s1567_s4 = inlined_call_operand.hbm [shape: f32[2,8,128], index: 4, kind: output, shape index: {}]  }
   0x1   :  { %11 = vsyncpa [#allocation3 + $0x1], 0 }
   0x2   :  { %12 = vsyncpa [#allocation6], 0 }
   0x3   :  { %13 = vsyncpa [#allocation4], 0 }
   0x4   :  { %15 = vsyncpa [#allocation4 + $0x1], 0  ;;  %s1270_s15 = smov 0   ;;  %s1272_s16 = smov 0  }
   0x5   :  { %s1274_s17 = smov 0   ;;  %s1276_s18 = smov 0  }
   0x6   :  { %s1278_s19 = smov 0   ;;  %s1280_s20 = smov 0  }
   0x7 LB: > { %s712_s21 = sadd.s32 4294967295, %s1234_s20   ;;  %s713_s22 = sadd.s32 4294967294, %s1234_s20   ;;  %s1234_s20 = sphi %s1280_s20, %s21_s20   ;;  %s1230_s19 = sphi %s1278_s19, %s1590_s19   ;;  %s1226_s18 = sphi %s1276_s18, %s1589_s18   ;;  %s1222_s17 = sphi %s1274_s17, %s1588_s17   ;;  %s1218_s16 = sphi %s1272_s16, %s1587_s16   ;;  %s1214_s15 = sphi %s1270_s15, %s1586_s15  }
   0x8   : > { %p55_p0 = scmp.ne.s32.totalorder %s1218_s16, %s1214_s15  ;;  %p1304_p1 = scmp.eq.s32.totalorder %s712_s21, 0 }
   0x9   : > { %p1308_p2 = scmp.eq.s32.totalorder %s712_s21, 1  ;;  %p150_p3 = scmp.eq.s32.totalorder %s713_s22, 1 }
   0xa   : > { %s1572_s23 = scalar_select %p1304_p1, 1, 0 }
   0xb   : > { %s1573_s24 = scalar_select %p1308_p2, 1, 0 }
   0xc   : > { %p1314_p4 = por %p1304_p1, %p55_p0  ;;  %p714_p5 = scmp.ge.s32.totalorder %s1234_s20, 1 }
   0xd   : > { %p1319_p6 = por %p150_p3, %p55_p0  ;;  %p157_p7 = scmp.lt.s32.totalorder %s1234_s20, 3 }
   0xe   : > { %s1574_s25 = scalar_select %p1314_p4, 1, 0 }
   0xf   : > { %s1575_s26 = scalar_select %p1319_p6, 1, 0 }
  0x10   : > { %p1324_p8 = pnand %p714_p5, %p157_p7  ;;  %s1236_s28 = smov [#allocation5]  }
  0x11   : > { %s170_s29 = sshll.u32 %s1236_s28, 4  ;;  %s1237_s30 = smov [#allocation7]   ;;  %s171_s29 = int_to_ptr.vmem [resolvable:$true] %s170_s29 }
  0x12   : > { %s1576_s27 = scalar_select %p1324_p8, 1, 0 }
  0x13   : > { %p986_p10 = pneg %p1324_p8  ;;  %s180_s5 = sshll.u32 %s1237_s30, 4  ;;  %s1337_s5 = int_to_ptr.vmem [resolvable:$true] %s180_s5 }
  0x14   : > { %s1062_s9 = scalar_lea.hbm %s1564_s1, 128 }
  0x15   : > { %p1333_p11 = pnand %p986_p10, %p1304_p1  ;;  %p1063_p12 = scmp.ne.s32.totalorder %s1564_s1, %s1062_s9 }
  0x16   : > { %p1069_p5 = scmp.lt.u32.totalorder %s1062_s9, %s1564_s1 }
  0x17   : > { %p1064_p13 = pneg %p1333_p11 }
  0x19   : > { %p1065_p0 = pnand %p1064_p13, %p1063_p12 }
  0x1b   : > { %p1066_p3 = pneg %p1065_p0 }
  0x1d   : > { %p1071_p7 = pnand %p1069_p5, %p1066_p3 }
  0x1f   : > { %1074 = shalt.err (!%p1071_p7)
}
  0x20   : > { %s1075_s14 = scalar_lea.vmem %s171_s29, 128  ;;  %p1083_p1 = scmp.lt.s32.totalorder %s171_s29, %s171_s29 }
  0x21   : > { %p1076_p10 = scmp.ne.s32.totalorder %s171_s29, %s1075_s14  ;;  %p1084_p4 = scmp.lt.s32.totalorder %s1075_s14, %s1075_s14 }
  0x23   : > { %p1078_p9 = pnand %p1076_p10, %p1064_p13  ;;  %p1085_p8 = por %p1084_p4, %p1083_p1 }
  0x25   : > { %p1079_p6 = pneg %p1078_p9 }
  0x27   : > { %p1086_p2 = pnand %p1085_p8, %p1079_p6 }
  0x29   : > { %1089 = shalt.err (!%p1086_p2)
}
  0x2a   : > { %989 = dma.hbm_to_vmem [thread:$0]  (!%p1333_p11), %s1564_s1, 128, %s171_s29, [#allocation6]  }
  0x2b   : > { %s1090_s7 = scalar_lea.hbm %s1565_s2, 6144 }
  0x2c   : > { %p1091_p9 = scmp.ne.s32.totalorder %s1565_s2, %s1090_s7  ;;  %p1097_p2 = scmp.lt.u32.totalorder %s1090_s7, %s1565_s2 }
  0x2e   : > { %p1093_p1 = pnand %p1091_p9, %p1064_p13 }
  0x30   : > { %p1094_p4 = pneg %p1093_p1 }
  0x32   : > { %p1099_p6 = pnand %p1097_p2, %p1094_p4 }
  0x34   : > { %1102 = shalt.err (!%p1099_p6)
}
  0x35   : > { %s1103_s29 = scalar_lea.vmem %s1337_s5, 6144  ;;  %p1111_p3 = scmp.lt.s32.totalorder %s1337_s5, %s1337_s5 }
  0x36   : > { %p1104_p8 = scmp.ne.s32.totalorder %s1337_s5, %s1103_s29  ;;  %p1112_p5 = scmp.lt.s32.totalorder %s1103_s29, %s1103_s29 }
  0x38   : > { %p1106_p12 = pnand %p1104_p8, %p1064_p13  ;;  %p1113_p7 = por %p1112_p5, %p1111_p3 }
  0x3a   : > { %p1107_p0 = pneg %p1106_p12 }
  0x3c   : > { %p1114_p10 = pnand %p1113_p7, %p1107_p0 }
  0x3e   : > { %1117 = shalt.err (!%p1114_p10)
}
  0x3f   : > { %s1238_s12 = smov 128   ;;  %s1239_s13 = smov 8  }
  0x40   : > { %992 = dma.hbm_to_vmem [thread:$0]  (!%p1333_p11), %s1565_s2, 6144, %s1337_s5, [#allocation6], %s1238_s12, %s1238_s12, %s1239_s13  }
  0x41   : > { %s33_s22 = sadd.s32 1, %s1230_s19  ;;  %s42_s28 = sadd.s32 1, %s1222_s17 }
  0x42   : > { %p35_p13 = scmp.ge.s32.totalorder %s33_s22, 2  ;;  %p49_p9 = scmp.ne.s32.totalorder %s1222_s17, %s1218_s16 }
  0x43   : > { %p50_p1 = scmp.eq.s32.totalorder %s1234_s20, 0  ;;  %p1003_p4 = scmp.lt.s32.totalorder %s1234_s20, 2 }
  0x44   : > { %s1592_s22 = smov (%p35_p13, %s33_s22), 0  ;;  %p1578_p6 = scmp.ne.s32.totalorder %s1573_s24, 0 }
  0x45   : > { %p51_p2 = por %p50_p1, %p49_p9  ;;  %s37_s6 = ssub.s32 %s1230_s19, %s1592_s22 }
  0x46   : > { %p1396_p8 = por %p1578_p6, %p49_p9  ;;  %s197_s7 = sand.u32 1, %s1222_s17  }
  0x47   : > { %p40_p12 = scmp.eq.s32.totalorder %s37_s6, 0  ;;  %s718_s5 = sshll.u32 %s197_s7, 3 }
  0x48   : > { %s719_s8 = sshll.u32 %s1230_s19, 7  ;;  %s201_s24 = scalar_lea.vmem [#allocation2], %s718_s5 }
  0x49   : > { %s1405_s9 = scalar_select %p40_p12, %s1222_s17, %s42_s28  }
  0x4a   : > { %s1410_s29 = scalar_lea.hbm %s1563_s0, %s719_s8  ;;  %s209_s12 = sshll.u32 %s201_s24, 4  ;;  %s1418_s12 = int_to_ptr.vmem [resolvable:$true] %s209_s12 }
  0x4b   : > { %p1414_p11 = pnand %p1003_p4, %p51_p2  ;;  %s198_s14 = scalar_lea.sflag [#allocation3], %s197_s7 }
  0x4c   : > { %s1118_s21 = scalar_lea.hbm %s1410_s29, 128  ;;  %s1123_s5 = scalar_lea.hbm %s1563_s0, 256 }
  0x4d   : > { %p1119_p0 = scmp.ne.s32.totalorder %s1410_s29, %s1118_s21  ;;  %p1120_p3 = pneg %p1414_p11 }
  0x4e   : > { %p1124_p10 = scmp.lt.u32.totalorder %s1410_s29, %s1563_s0  ;;  %p1125_p13 = scmp.lt.u32.totalorder %s1123_s5, %s1118_s21 }
  0x4f   : > { %p1121_p5 = pnand %p1120_p3, %p1119_p0  ;;  %p1127_p1 = scmp.lt.u32.totalorder %s1118_s21, %s1410_s29 }
  0x50   : > { %p1126_p9 = por %p1125_p13, %p1124_p10 }
  0x51   : > { %p1122_p7 = pneg %p1121_p5 }
  0x52   : > { %p1128_p4 = por %p1127_p1, %p1126_p9 }
  0x54   : > { %p1129_p2 = pnand %p1128_p4, %p1122_p7 }
  0x56   : > { %1132 = shalt.err (!%p1129_p2)
}
  0x57   : > { %s1133_s7 = scalar_lea.vmem %s1418_s12, 128  ;;  %s1240_s11 = smov [#allocation2]  }
  0x58   : > { %p1134_p6 = scmp.ne.s32.totalorder %s1418_s12, %s1133_s7  ;;  %s1138_s24 = sshll.u32 %s1240_s11, 4  ;;  %s1139_s24 = int_to_ptr.vmem [resolvable:$false] %s1138_s24 }
  0x59   : > { %s1140_s28 = scalar_lea.vmem %s1139_s24, 256  ;;  %p1141_p5 = scmp.lt.s32.totalorder %s1418_s12, %s1139_s24 }
  0x5a   : > { %p1136_p12 = pnand %p1134_p6, %p1120_p3  ;;  %p1142_p10 = scmp.lt.s32.totalorder %s1140_s28, %s1133_s7 }
  0x5c   : > { %p1137_p0 = pneg %p1136_p12  ;;  %p1143_p13 = por %p1142_p10, %p1141_p5 }
  0x5e   : > { %p1144_p9 = pnand %p1143_p13, %p1137_p0 }
  0x60   : > { %1147 = shalt.err (!%p1144_p9)
}
  0x61   : > { %996 = dma.hbm_to_vmem [thread:$0]  (!%p1414_p11), %s1410_s29, 128, %s1418_s12, %s198_s14  }
  0x62   : > { %p1581_p7 = scmp.ne.s32.totalorder %s1576_s27, 0 }
  0x63   : > { %s1448_s21 = sand.u32 (!%p1581_p7), 1, %s1218_s16   ;;  %p1582_p3 = scmp.ne.s32.totalorder (!%p1581_p7), %s1574_s25, 0 }
  0x64   : > { %218 = sbr.rel (%p1581_p7) target bundleno = 623 (0x26f), region = 36  ;;  %s721_s6 = sshll.u32 (!%p1581_p7), %s1448_s21, 3 }
  0x65   : > { %s221_s5 = scalar_lea.sflag (!%p1581_p7), [#allocation3], %s1448_s21  ;;  %s1454_s8 = scalar_lea.vmem (!%p1581_p7), [#allocation2], %s721_s6 }
  0x6b   : > { %1201 = dma.done.wait (%p1582_p3), %s221_s5, 128  }
  0x6c   : > { %1203 = vsyncadd (%p1582_p3), %s221_s5, 4294967168  ;;  %p1583_p11 = scmp.ne.s32.totalorder %s1572_s23, 0 }
  0x6e   : > { %1205 = dma.done.wait (%p1583_p11), [#allocation6], 6272  }
  0x6f   : > { %1207 = vsyncadd (%p1583_p11), [#allocation6], 4294961024  ;;  %v1241_v0 = vmov 0.0|0.0   ;;  %vm1242_vm0 = vmmov 0   ;;  %v1243_v1 = vmov 0.0   ;;  %v260_v2 = vld [vmem:[#allocation7] sm:$0xff] }
  0x70   : > { %899 = vmatprep.subr.bf16.mxu0 %v1241_v0  ;;  %923 = vmatprep.subr.bf16.mxu1 %v1241_v0  ;;  %v261_v3 = vld [vmem:[#allocation7 + $0x8] sm:$0xff]  ;;  %v347_v4 = vld [vmem:[#allocation7 + $0x80] sm:$0xff]  ;;  %v262_v7 = vld [vmem:[#allocation7 + $0x10] sm:$0xff]  ;;  %vm520_vm1 = vcmask 195584   ;;  %s727_s27 = sshll.u32 %s1226_s18, 7  ;;  %s256_s29 = scalar_lea.vmem [#allocation8], %s721_s6 }
  0x71   : > { %817 = vmatprep.mubr.msk.f32.mxu0 %vm1242_vm0, %v1243_v1  ;;  %852 = vmatprep.mubr.msk.f32.mxu1 %vm1242_vm0, %v1243_v1  ;;  %v900_v5 = vpack.c.bf16 %v261_v3, %v260_v2  ;;  %v348_v6 = vld [vmem:[#allocation7 + $0x88] sm:$0xff]  ;;  %v263_v8 = vld [vmem:[#allocation7 + $0x18] sm:$0xff]  ;;  %v349_v10 = vld [vmem:[#allocation7 + $0x90] sm:$0xff]  ;;  %s613_s12 = sshll.u32 %s256_s29, 4  ;;  %s1514_s10 = scalar_lea.hbm %s1567_s4, %s727_s27  ;;  %s1516_s12 = int_to_ptr.vmem [resolvable:$true] %s613_s12 }
  0x72   : > { %v924_v9 = vpack.c.bf16 %v348_v6, %v347_v4  ;;  %v350_v11 = vld [vmem:[#allocation7 + $0x98] sm:$0xff]  ;;  %v903_v12 = vpack.c.bf16 %v263_v8, %v262_v7  ;;  %v264_v14 = vld [vmem:[#allocation7 + $0x20] sm:$0xff]  ;;  %v265_v15 = vld [vmem:[#allocation7 + $0x28] sm:$0xff]  ;;  %s599_s7 = scalar_lea.sflag [#allocation4], %s1448_s21  ;;  %s1148_s11 = scalar_lea.vmem %s1516_s12, 128 }
  0x73   : > { %901 = vmatpush3.bf16.msra.mxu0 %v900_v5  ;;  %v927_v13 = vpack.c.bf16 %v350_v11, %v349_v10  ;;  %v351_v16 = vld [vmem:[#allocation7 + $0xa0] sm:$0xff]  ;;  %v352_v17 = vld [vmem:[#allocation7 + $0xa8] sm:$0xff]  ;;  %v906_v18 = vpack.c.bf16 %v265_v15, %v264_v14  ;;  %v266_v20 = vld [vmem:[#allocation7 + $0x30] sm:$0xff]  ;;  %p1149_p1 = scmp.ne.s32.totalorder %s1516_s12, %s1148_s11  ;;  %s1244_s18 = smov [#allocation8]  }
  0x74   : > { %925 = vmatpush3.bf16.msra.mxu1 %v924_v9  ;;  %902 = vmatprep.subr.bf16.mxu0 %v1241_v0  ;;  %v930_v19 = vpack.c.bf16 %v352_v17, %v351_v16  ;;  %v267_v21 = vld [vmem:[#allocation7 + $0x38] sm:$0xff]  ;;  %v353_v22 = vld [vmem:[#allocation7 + $0xb0] sm:$0xff]  ;;  %v268_v26 = vld [vmem:[#allocation7 + $0x40] sm:$0xff]  ;;  %s1152_s24 = sshll.u32 %s1244_s18, 4  ;;  %s1153_s24 = int_to_ptr.vmem [resolvable:$false] %s1152_s24 }
  0x75   : > { %926 = vmatprep.subr.bf16.mxu1 %v1241_v0  ;;  %v354_v23 = vld [vmem:[#allocation7 + $0xb8] sm:$0xff]  ;;  %v909_v24 = vpack.c.bf16 %v267_v21, %v266_v20  ;;  %v269_v27 = vld [vmem:[#allocation7 + $0x48] sm:$0xff]  ;;  %v355_v28 = vld [vmem:[#allocation7 + $0xc0] sm:$0xff]  ;;  %p1150_p4 = pnand %p1149_p1, %p1396_p8  ;;  %s1154_s28 = scalar_lea.vmem %s1153_s24, 256 }
  0x76   : > { %v933_v25 = vpack.c.bf16 %v354_v23, %v353_v22  ;;  %v356_v29 = vld [vmem:[#allocation7 + $0xc8] sm:$0xff]  ;;  %v912_v30 = vpack.c.bf16 %v269_v27, %v268_v26  ;;  %v270_v32 = vld [vmem:[#allocation7 + $0x50] sm:$0xff]  ;;  %v271_v33 = vld [vmem:[#allocation7 + $0x58] sm:$0xff]  ;;  %p1155_p6 = scmp.lt.s32.totalorder %s1516_s12, %s1153_s24  ;;  %p1156_p12 = scmp.lt.s32.totalorder %s1154_s28, %s1148_s11 }
  0x77   : > { %904 = vmatpush3.bf16.msra.mxu0 %v903_v12  ;;  %v936_v31 = vpack.c.bf16 %v356_v29, %v355_v28  ;;  %v357_v34 = vld [vmem:[#allocation7 + $0xd0] sm:$0xff]  ;;  %v358_v35 = vld [vmem:[#allocation7 + $0xd8] sm:$0xff]  ;;  %v915_v36 = vpack.c.bf16 %v271_v33, %v270_v32  ;;  %v272_v38 = vld [vmem:[#allocation7 + $0x60] sm:$0xff]  ;;  %p1151_p2 = pneg %p1150_p4 }
  0x78   : > { %928 = vmatpush3.bf16.msra.mxu1 %v927_v13  ;;  %905 = vmatprep.subr.bf16.mxu0 %v1241_v0  ;;  %v939_v37 = vpack.c.bf16 %v358_v35, %v357_v34  ;;  %v273_v39 = vld [vmem:[#allocation7 + $0x68] sm:$0xff]  ;;  %v359_v40 = vld [vmem:[#allocation7 + $0xe0] sm:$0xff]  ;;  %v274_v44 = vld [vmem:[#allocation7 + $0x70] sm:$0xff]  ;;  %p1157_p0 = por %p1156_p12, %p1155_p6 }
  0x79   : > { %929 = vmatprep.subr.bf16.mxu1 %v1241_v0  ;;  %v360_v41 = vld [vmem:[#allocation7 + $0xe8] sm:$0xff]  ;;  %v918_v42 = vpack.c.bf16 %v273_v39, %v272_v38  ;;  %v275_v45 = vld [vmem:[#allocation7 + $0x78] sm:$0xff]  ;;  %v361_v46 = vld [vmem:[#allocation7 + $0xf0] sm:$0xff] }
  0x7a   : > { %v942_v43 = vpack.c.bf16 %v360_v41, %v359_v40  ;;  %v362_v47 = vld [vmem:[#allocation7 + $0xf8] sm:$0xff]  ;;  %v921_v48 = vpack.c.bf16 %v275_v45, %v274_v44  ;;  %v434_v50 = vld [vmem:[#allocation7 + $0x100] sm:$0xff]  ;;  %v435_v51 = vld [vmem:[#allocation7 + $0x108] sm:$0xff]  ;;  %p1158_p5 = pnand %p1157_p0, %p1151_p2 }
  0x7b   : > { %907 = vmatpush3.bf16.msra.mxu0 %v906_v18  ;;  %v945_v49 = vpack.c.bf16 %v362_v47, %v361_v46  ;;  %v1485_v52 = vld [vmem:[%s1454_s8] sm:$0xff]  ;;  %v948_v53 = vpack.c.bf16 %v435_v51, %v434_v50  ;;  %v437_v55 = vld [vmem:[#allocation7 + $0x118] sm:$0xff]  ;;  %v438_v57 = vld [vmem:[#allocation7 + $0x120] sm:$0xff] }
  0x7c   : > { %931 = vmatpush3.bf16.msra.mxu1 %v930_v19  ;;  %908 = vmatprep.subr.bf16.mxu0 %v1241_v0  ;;  %v436_v54 = vld [vmem:[#allocation7 + $0x110] sm:$0xff]  ;;  %v439_v58 = vld [vmem:[#allocation7 + $0x128] sm:$0xff]  ;;  %v441_v61 = vld [vmem:[#allocation7 + $0x138] sm:$0xff] }
  0x7d   : > { %932 = vmatprep.subr.bf16.mxu1 %v1241_v0  ;;  %v951_v56 = vpack.c.bf16 %v437_v55, %v436_v54  ;;  %v954_v59 = vpack.c.bf16 %v439_v58, %v438_v57  ;;  %v440_v60 = vld [vmem:[#allocation7 + $0x130] sm:$0xff]  ;;  %v442_v63 = vld [vmem:[#allocation7 + $0x140] sm:$0xff]  ;;  %v443_v2 = vld [vmem:[#allocation7 + $0x148] sm:$0xff] }
  0x7e   : > { %v957_v62 = vpack.c.bf16 %v441_v61, %v440_v60  ;;  %v960_v3 = vpack.c.bf16 %v443_v2, %v442_v63  ;;  %v444_v4 = vld [vmem:[#allocation7 + $0x150] sm:$0xff]  ;;  %v445_v5 = vld [vmem:[#allocation7 + $0x158] sm:$0xff]  ;;  %v446_v7 = vld [vmem:[#allocation7 + $0x160] sm:$0xff] }
  0x7f   : > { %910 = vmatpush3.bf16.msra.mxu0 %v909_v24  ;;  %v963_v6 = vpack.c.bf16 %v445_v5, %v444_v4  ;;  %v447_v8 = vld [vmem:[#allocation7 + $0x168] sm:$0xff]  ;;  %v448_v10 = vld [vmem:[#allocation7 + $0x170] sm:$0xff]  ;;  %v449_v11 = vld [vmem:[#allocation7 + $0x178] sm:$0xff] }
  0x80   : > { %934 = vmatpush3.bf16.msra.mxu1 %v933_v25  ;;  %911 = vmatprep.subr.bf16.mxu0 %v1241_v0  ;;  %v966_v9 = vpack.c.bf16 %v447_v8, %v446_v7  ;;  %v969_v12 = vpack.c.bf16 %v449_v11, %v448_v10  ;;  %v257_v18 = vld [vmem:[#allocation5] sm:$0xff] }
  0x81   : > { %935 = vmatprep.subr.bf16.mxu1 %v1241_v0 }
  0x83   : > { %913 = vmatpush3.bf16.msra.mxu0 %v912_v30 }
  0x84   : > { %937 = vmatpush3.bf16.msra.mxu1 %v936_v31  ;;  %914 = vmatprep.subr.bf16.mxu0 %v1241_v0 }
  0x85   : > { %938 = vmatprep.subr.bf16.mxu1 %v1241_v0 }
  0x87   : > { %916 = vmatpush3.bf16.msra.mxu0 %v915_v36 }
  0x88   : > { %940 = vmatpush3.bf16.msra.mxu1 %v939_v37  ;;  %917 = vmatprep.subr.bf16.mxu0 %v1241_v0 }
  0x89   : > { %941 = vmatprep.subr.bf16.mxu1 %v1241_v0 }
  0x8b   : > { %919 = vmatpush3.bf16.msra.mxu0 %v918_v42 }
  0x8c   : > { %943 = vmatpush3.bf16.msra.mxu1 %v942_v43  ;;  %920 = vmatprep.subr.bf16.mxu0 %v1241_v0 }
  0x8d   : > { %944 = vmatprep.subr.bf16.mxu1 %v1241_v0 }
  0x8f   : > { %922 = vmatpush3.bf16.msra.mxu0 %v921_v48 }
  0x90   : > { %946 = vmatpush3.bf16.msra.mxu1 %v945_v49  ;;  %947 = vmatprep.subr.bf16.mxu0 %v1241_v0 }
  0x91   : > { %971 = vmatprep.subr.bf16.mxu1 %v1241_v0 }
  0x92   : > { %818 = vmatmul.mubr.f32.vlgmr.msra.gmra.mrb[0].mxu0 %v1485_v52 }
  0x93   : > { %853 = vmatmul.mubr.f32.vlgmr.msra.gmra.mrb[0].mxu1 %v1485_v52  ;;  %949 = vmatpush3.bf16.msra.mxu0 %v948_v53 }
  0x94   : > { %950 = vmatprep.subr.bf16.mxu0 %v1241_v0  ;;  %887 = vmatprep.mubr.msk.f32.mxu0 %vm1242_vm0, %v1243_v1 }
  0x95   : > { %896 = vmatprep.mubr.msk.f32.mxu1 %vm1242_vm0, %v1243_v1 }
  0x97   : > { %952 = vmatpush3.bf16.msra.mxu0 %v951_v56 }
  0x98   : > { %953 = vmatprep.subr.bf16.mxu0 %v1241_v0 }
  0x9b   : > { %955 = vmatpush3.bf16.msra.mxu0 %v954_v59 }
  0x9c   : > { %956 = vmatprep.subr.bf16.mxu0 %v1241_v0 }
  0x9f   : > { %958 = vmatpush3.bf16.msra.mxu0 %v957_v62 }
  0xa0   : > { %959 = vmatprep.subr.bf16.mxu0 %v1241_v0 }
  0xa3   : > { %961 = vmatpush3.bf16.msra.mxu0 %v960_v3 }
  0xa4   : > { %962 = vmatprep.subr.bf16.mxu0 %v1241_v0 }
  0xa7   : > { %964 = vmatpush3.bf16.msra.mxu0 %v963_v6 }
  0xa8   : > { %965 = vmatprep.subr.bf16.mxu0 %v1241_v0 }
  0xab   : > { %967 = vmatpush3.bf16.msra.mxu0 %v966_v9 }
  0xac   : > { %968 = vmatprep.subr.bf16.mxu0 %v1241_v0  ;;  %v258_v0 = vld [vmem:[%s1566_s3] sm:$0xff] }
  0xaf   : > { %970 = vmatpush3.bf16.msra.mxu0 %v969_v12 }
  0xb2   : > { %888 = vmatmul.mubr.f32.vlgmr.msra.gmra.mrb[2].mxu0 %v1485_v52 }
 0x165   : > { %v342_v13 = vpop.f32.mrb[0].mxu0 }
 0x166   : > { %v819_v14 = vpop.f32.mrb[1].mxu0  ;;  %v429_v15 = vpop.f32.mrb[0].mxu1 }
 0x167   : > { %v972_v16 = vpack.c.bf16 %v429_v15, %v342_v13  ;;  %v854_v17 = vpop.f32.mrb[1].mxu1 }
 0x169   : > { %973 = vmatpush3.bf16.msra.mxu1 %v972_v16 }
 0x16a   : > { %894 = vmatprep.subr.mxu1 %v1243_v1 }
 0x185   : > { %v516_v19 = vpop.f32.mrb[2].mxu0 }
 0x186   : > { %v889_v20 = vpop.f32.mrb[3].mxu0  ;;  %895 = vmatpush3.msra.mxu1 %v516_v19 }
 0x187   : > { %897 = vmatmul.mubr.msk.f32.vlgmr.msra.gmra.mrb[2].mxu1 %vm520_vm1, %v257_v18 }
 0x25a   : > { %v590_v21 = vpop.f32.mrb[2].mxu1 }
 0x25b   : > { %v594_v22 = vadd.f32 %v590_v21, %v258_v0  ;;  %v898_v23 = vpop.f32.mrb[3].mxu1 }
 0x25d   : > { %v595_v1 = vadd.f32 %v594_v22, %v1485_v52 }
 0x25f   : > { %v596_v24 = vmax.f32 %v595_v1, 0.0 }
 0x261   : > { %597 = vst [vmem:[%s256_s29] sm:$0xff] %v596_v24 }
 0x262   : > { %1161 = shalt.err (!%p1158_p5)
}
 0x263   : > { %s1162_s21 = scalar_lea.hbm %s1514_s10, 128  ;;  %s1166_s8 = scalar_lea.hbm %s1567_s4, 256 }
 0x264   : > { %p1163_p10 = scmp.ne.s32.totalorder %s1514_s10, %s1162_s21  ;;  %p1167_p7 = scmp.lt.u32.totalorder %s1514_s10, %s1567_s4 }
 0x265   : > { %p1168_p3 = scmp.lt.u32.totalorder %s1166_s8, %s1162_s21  ;;  %p1170_p1 = scmp.lt.u32.totalorder %s1162_s21, %s1514_s10 }
 0x266   : > { %p1164_p13 = pnand %p1163_p10, %p1396_p8 }
 0x267   : > { %p1169_p11 = por %p1168_p3, %p1167_p7 }
 0x268   : > { %p1165_p9 = pneg %p1164_p13 }
 0x269   : > { %p1171_p4 = por %p1170_p1, %p1169_p11 }
 0x26b   : > { %p1172_p2 = pnand %p1171_p4, %p1165_p9 }
 0x26d   : > { %1175 = shalt.err (!%p1172_p2)
}
 0x26e   : > { %984 = dma.vmem_to_hbm [thread:$0]  (%p1396_p8), %s1516_s12, 128, %s1514_s10, %s599_s7  }
 0x26f PF: > { %s625_s27 = sand.u32 1, %s1214_s15   ;;  %p1584_p6 = scmp.ne.s32.totalorder %s1575_s26, 0 }
 0x270   : > { %p1585_p12 = scmp.ge.s32.totalorder %s1234_s20, 2  ;;  %s626_s29 = scalar_lea.sflag [#allocation4], %s625_s27 }
 0x272   : > { %p998_p0 = pnand %p1585_p12, %p1584_p6 }
 0x274   : > { %1209 = dma.done.wait (!%p998_p0), %s626_s29, 128  }
 0x275   : > { %1211 = vsyncadd (!%p998_p0), %s626_s29, 4294967168  ;;  %s21_s20 = sadd.s32 1, %s1234_s20   ;;  %s1586_s15 = smov %s1218_s16 }
 0x276   : > { %p18_p5 = scmp.ge.s32.totalorder %s21_s20, 4   ;;  %s1587_s16 = smov %s1222_s17 }
 0x277   : > { %s1588_s17 = smov %s1405_s9  ;;  %s1589_s18 = smov %s1230_s19 }
 0x278   : > { %s1590_s19 = smov %s1592_s22  ;;  %20 = sbr.rel (!%p18_p5) target bundleno = 7 (0x7), region = 91 }
 0x27f   :  { %631 = vsyncpa [#allocation3], 1 }
 0x280   :  { %633 = vsyncpa [#allocation3 + $0x1], 1 }
 0x281   :  { %634 = vsyncpa [#allocation6], 1 }
 0x282   :  { %635 = vsyncpa [#allocation4], 1 }
 0x283   :  { %637 = vsyncpa [#allocation4 + $0x1], 1 }

</bundles_post_ra>
